<compile_context>
chip_gen: v6e
topology: v6e:2x2x1
jax: 0.10.0
libtpu: 0.0.40
codegen_flags: <defaults>
</compile_context>

<pallas_src>
import jax
import jax.numpy as jnp
from jax.experimental import pallas as pl
from jax.experimental.pallas import tpu as pltpu

_SUBLANES = 8


def _round_up(x, m):
    return ((x + m - 1) // m) * m


def _policy_mlp_kernel(x_ref, w1_ref, b1_ref, w2_ref, b2_ref, o_ref):
    # hidden = relu(x @ W1 + b1)   -- MXU matmul, VPU bias-add + ReLU
    h = jnp.dot(x_ref[...], w1_ref[...], preferred_element_type=jnp.float32)
    h = jnp.maximum(h + b1_ref[...], 0.0)          # (TB, H) + (1, H)
    # out = h @ W2 + b2            -- true-size (TB, A) store, masked on the
    # ragged last block only
    out = jnp.dot(h, w2_ref[...], preferred_element_type=jnp.float32)
    o_ref[...] = (out + b2_ref[...]).astype(o_ref.dtype)


def policy_forward(state, w1, b1, w2, b2, *, block_b=4096):
    """Pallas forward pass of the Gaussian-mean policy MLP.

    state: (B, state_space) float32
    w1:    (state_space, 16) float32
    b1:    (16,)              float32
    w2:    (16, action_space) float32
    b2:    (action_space,)    float32
    returns: (B, action_space) float32 action means
    """
    B, S = state.shape
    H = w1.shape[1]
    A = w2.shape[1]

    b1_2d = b1.reshape(1, H)
    b2_2d = b2.reshape(1, A)

    # Sublane-aligned batch tile; no padding of the array itself — the grid is
    # cdiv(B, TB) and Pallas masks the ragged last block.
    TB = _round_up(min(block_b, B), _SUBLANES)
    # For large batches make sure there are >= 2 tiles so v7x's two
    # TensorCores both get work (harmless / neutral on v5e, v6e).
    if B > 2 * _SUBLANES and pl.cdiv(B, TB) < 2:
        TB = _round_up(pl.cdiv(B, 2), _SUBLANES)
    grid = (pl.cdiv(B, TB),)

    cost = pl.CostEstimate(
        flops=2 * B * (S * H + H * A),
        transcendentals=0,
        bytes_accessed=4 * (B * S + B * A + S * H + H + H * A + A),
    )

    out = pl.pallas_call(
        _policy_mlp_kernel,
        out_shape=jax.ShapeDtypeStruct((B, A), jnp.float32),
        grid=grid,
        in_specs=[
            # streaming activation tile (VMEM is the default memory space)
            pl.BlockSpec((TB, S), lambda i: (i, 0)),
            # weights / biases: constant index_map -> DMA'd once, stay resident
            pl.BlockSpec((S, H), lambda i: (0, 0)),
            pl.BlockSpec((1, H), lambda i: (0, 0)),
            pl.BlockSpec((H, A), lambda i: (0, 0)),
            pl.BlockSpec((1, A), lambda i: (0, 0)),
        ],
        out_specs=pl.BlockSpec((TB, A), lambda i: (i, 0)),
        compiler_params=pltpu.CompilerParams(
            dimension_semantics=("parallel",),   # batch tiles across TCs (v7x)
        ),
        cost_estimate=cost,
    )(state, w1, b1_2d, w2, b2_2d)

    return out


def policy_forward_ref(state, w1, b1, w2, b2):
    """Plain-JAX reference (mirrors the PyTorch forward exactly)."""
    h = jnp.maximum(state @ w1 + b1, 0.0)
    return h @ w2 + b2


if __name__ == "__main__":
    # Shapes consistent with the module: a continuous-control env with a
    # 4-dim observation space and 2-dim action space, hidden size 16.
    batch = 8
    state_space = 4
    hidden = 16
    action_space = 2

    key = jax.random.PRNGKey(0)
    k_x, k_w1, k_b1, k_w2, k_b2, k_x2, k_x3 = jax.random.split(key, 7)

    state = jax.random.normal(k_x, (batch, state_space), dtype=jnp.float32)
    w1 = jax.random.normal(k_w1, (state_space, hidden), dtype=jnp.float32) * 0.5
    b1 = jax.random.normal(k_b1, (hidden,), dtype=jnp.float32) * 0.1
    w2 = jax.random.normal(k_w2, (hidden, action_space), dtype=jnp.float32) * 0.5
    b2 = jax.random.normal(k_b2, (action_space,), dtype=jnp.float32) * 0.1

    out = jax.block_until_ready(policy_forward(state, w1, b1, w2, b2))
    ref = policy_forward_ref(state, w1, b1, w2, b2)
    assert out.shape == (batch, action_space)
    assert jnp.allclose(out, ref, atol=1e-5, rtol=1e-5), "mismatch vs reference"

    # Ragged single-tile path: batch not a multiple of 8.
    state2 = jax.random.normal(k_x2, (13, state_space), dtype=jnp.float32)
    out2 = jax.block_until_ready(policy_forward(state2, w1, b1, w2, b2))
    ref2 = policy_forward_ref(state2, w1, b1, w2, b2)
    assert out2.shape == (13, action_space)
    assert jnp.allclose(out2, ref2, atol=1e-5, rtol=1e-5), "mismatch (ragged batch)"

    # Multi-tile grid with a ragged last block (small block_b forces tiling).
    state3 = jax.random.normal(k_x3, (1037, state_space), dtype=jnp.float32)
    out3 = jax.block_until_ready(policy_forward(state3, w1, b1, w2, b2, block_b=512))
    ref3 = policy_forward_ref(state3, w1, b1, w2, b2)
    assert out3.shape == (1037, action_space)
    assert jnp.allclose(out3, ref3, atol=1e-5, rtol=1e-5), "mismatch (tiled batch)"

    print("KERNEL_OK")
</pallas_src>

<mosaic_0001>
module attributes {stable_mosaic.version = 11 : i64} {
  func.func @_policy_mlp_kernel(%arg0: i32, %arg1: memref<8x4xf32, #tpu.memory_space<vmem>>, %arg2: memref<4x16xf32, #tpu.memory_space<vmem>>, %arg3: memref<1x16xf32, #tpu.memory_space<vmem>>, %arg4: memref<16x2xf32, #tpu.memory_space<vmem>>, %arg5: memref<1x2xf32, #tpu.memory_space<vmem>>, %arg6: memref<8x2xf32, #tpu.memory_space<vmem>>) attributes {dimension_semantics = [#tpu.dimension_semantics<parallel>], iteration_bounds = array<i64: 1>, scalar_prefetch = 0 : i64, scratch_operands = 0 : i64, tpu.core_type = #tpu.core_type<tc>, window_params = [{transform_indices = @transform_0, window_bounds = array<i64: 8, 4>}, {pipeline_mode = #tpu.pipeline_mode<synchronous>, transform_indices = @transform_1, window_bounds = array<i64: 4, 16>}, {pipeline_mode = #tpu.pipeline_mode<synchronous>, transform_indices = @transform_2, window_bounds = array<i64: 1, 16>}, {pipeline_mode = #tpu.pipeline_mode<synchronous>, transform_indices = @transform_3, window_bounds = array<i64: 16, 2>}, {pipeline_mode = #tpu.pipeline_mode<synchronous>, transform_indices = @transform_4, window_bounds = array<i64: 1, 2>}, {transform_indices = @transform_5, window_bounds = array<i64: 8, 2>}]} {
    %c0 = arith.constant 0 : index
    %c0_0 = arith.constant 0 : index
    %0 = vector.load %arg1[%c0, %c0_0] : memref<8x4xf32, #tpu.memory_space<vmem>>, vector<8x4xf32>
    %c0_1 = arith.constant 0 : index
    %c0_2 = arith.constant 0 : index
    %1 = vector.load %arg2[%c0_1, %c0_2] : memref<4x16xf32, #tpu.memory_space<vmem>>, vector<4x16xf32>
    %cst = arith.constant dense<0.000000e+00> : vector<8x16xf32>
    %2 = tpu.matmul %0, %1, %cst {dimension_numbers = #tpu.dot_dimension_numbers<[1], [0], [0], [1], [0, 0, 1, 1], [], []>} : vector<8x4xf32>, vector<4x16xf32>, vector<8x16xf32> -> vector<8x16xf32>
    %c0_3 = arith.constant 0 : index
    %c0_4 = arith.constant 0 : index
    %3 = vector.load %arg3[%c0_3, %c0_4] : memref<1x16xf32, #tpu.memory_space<vmem>>, vector<1x16xf32>
    %4 = vector.broadcast %3 : vector<1x16xf32> to vector<8x16xf32>
    %5 = arith.addf %2, %4 : vector<8x16xf32>
    %cst_5 = arith.constant 0.000000e+00 : f32
    %6 = vector.broadcast %cst_5 : f32 to vector<8x16xf32>
    %7 = arith.maximumf %5, %6 : vector<8x16xf32>
    %c0_6 = arith.constant 0 : index
    %c0_7 = arith.constant 0 : index
    %8 = vector.load %arg4[%c0_6, %c0_7] : memref<16x2xf32, #tpu.memory_space<vmem>>, vector<16x2xf32>
    %cst_8 = arith.constant dense<0.000000e+00> : vector<8x2xf32>
    %9 = tpu.matmul %7, %8, %cst_8 {dimension_numbers = #tpu.dot_dimension_numbers<[1], [0], [0], [1], [0, 0, 1, 1], [], []>} : vector<8x16xf32>, vector<16x2xf32>, vector<8x2xf32> -> vector<8x2xf32>
    %c0_9 = arith.constant 0 : index
    %c0_10 = arith.constant 0 : index
    %10 = vector.load %arg5[%c0_9, %c0_10] : memref<1x2xf32, #tpu.memory_space<vmem>>, vector<1x2xf32>
    %11 = vector.broadcast %10 : vector<1x2xf32> to vector<8x2xf32>
    %12 = arith.addf %9, %11 : vector<8x2xf32>
    %c0_11 = arith.constant 0 : index
    %c0_12 = arith.constant 0 : index
    %13 = vector.load %arg6[%c0_11, %c0_12] : memref<8x2xf32, #tpu.memory_space<vmem>>, vector<8x2xf32>
    tpu.vector_store %arg6[%c0_11, %c0_12], %12 {strides = array<i32>} : memref<8x2xf32, #tpu.memory_space<vmem>>, vector<8x2xf32>,
    return
  }
  func.func @transform_0(%arg0: i32) -> (i32, i32) {
    %c0_i32 = arith.constant 0 : i32
    %c0_i32_0 = arith.constant 0 : i32
    return %arg0, %c0_i32 : i32, i32
  }
  func.func @transform_1(%arg0: i32) -> (i32, i32) {
    %c0_i32 = arith.constant 0 : i32
    %c0_i32_0 = arith.constant 0 : i32
    %c0_i32_1 = arith.constant 0 : i32
    return %c0_i32, %c0_i32_0 : i32, i32
  }
  func.func @transform_2(%arg0: i32) -> (i32, i32) {
    %c0_i32 = arith.constant 0 : i32
    %c0_i32_0 = arith.constant 0 : i32
    %c0_i32_1 = arith.constant 0 : i32
    return %c0_i32, %c0_i32_0 : i32, i32
  }
  func.func @transform_3(%arg0: i32) -> (i32, i32) {
    %c0_i32 = arith.constant 0 : i32
    %c0_i32_0 = arith.constant 0 : i32
    %c0_i32_1 = arith.constant 0 : i32
    return %c0_i32, %c0_i32_0 : i32, i32
  }
  func.func @transform_4(%arg0: i32) -> (i32, i32) {
    %c0_i32 = arith.constant 0 : i32
    %c0_i32_0 = arith.constant 0 : i32
    %c0_i32_1 = arith.constant 0 : i32
    return %c0_i32, %c0_i32_0 : i32, i32
  }
  func.func @transform_5(%arg0: i32) -> (i32, i32) {
    %c0_i32 = arith.constant 0 : i32
    %c0_i32_0 = arith.constant 0 : i32
    return %arg0, %c0_i32 : i32, i32
  }
}

</mosaic_0001>

<bundles_post_ra>
// kernel: tpu_custom_call.1
= control target key start
LH: loop header
LB: loop body
LE: loop exit
PB: predicated region body
PF: predicated region fallthrough
CT: control target
= control target key end

     0   :  { %vm33_vm0 = vcmask 1043456   ;;  %vm29_vm1 = vcmask 31744   ;;  %v221_v0 = vmov 0.0   ;;  %vm222_vm2 = vmmov 0   ;;  %s274_s1 = inlined_call_operand.vmem [shape: f32[4,16], index: 1, kind: input, shape index: {}]   ;;  %s275_s0 = inlined_call_operand.vmem [shape: f32[8,4], index: 0, kind: input, shape index: {}]   ;;  %s276_s3 = inlined_call_operand.vmem [shape: f32[16,2], index: 3, kind: input, shape index: {}]   ;;  %s277_s2 = inlined_call_operand.vmem [shape: f32[1,16], index: 2, kind: input, shape index: {}]   ;;  %s278_s4 = inlined_call_operand.vmem [shape: f32[1,2], index: 4, kind: input, shape index: {}]   ;;  %s279_s5 = inlined_call_operand.vmem [shape: f32[8,2], index: 5, kind: output, shape index: {}]  }
   0x1   :  { %207 = vmatprep.subr.mxu0 %v221_v0  ;;  %v21_v1 = vld [vmem:[%s274_s1] sm:$0xf]  ;;  %209 = vmatprep.mubr.msk.f32.mxu0 %vm222_vm2, %v221_v0  ;;  %v109_v3 = vld [vmem:[%s276_s3 + $0x8] sm:$0xff]  ;;  %vm117_vm3 = vcmask 130048   ;;  %vm191_vm4 = vcmask 15360  }
   0x2   :  { %v20_v2 = vld [vmem:[%s275_s0] sm:$0xff]  ;;  %208 = vmatpush3.msk.msra.mxu0 %vm33_vm0, %v21_v1  ;;  %212 = vmatprep.subr.mxu1 %v221_v0 }
   0x3   :  { %210 = vmatmul.mubr.msk.f32.vlgmr.msra.gmra.mxu0 %vm29_vm1, %v20_v2  ;;  %216 = vmatprep.mubr.msk.f32.mxu1 %vm222_vm2, %v221_v0  ;;  %v108_v4 = vld [vmem:[%s276_s3] sm:$0xff] }
   0x4   :  { %213 = vmatpush3.msra.mxu1 %v109_v3  ;;  %v197_v5 = vld [vmem:[%s277_s2] ss:$0 sm:$0xff] }
   0x5   :  { %214 = vmatprep.subr.mxu1 %v221_v0  ;;  %v200_v10 = vld [vmem:[%s278_s4] ss:$0 sm:$0xff] }
   0x6   :  { %215 = vmatpush3.msra.mxu1 %v108_v4 }
  0xc3   :  { %v103_v6 = vpop.f32.mrf.mxu0 }
  0xc4   :  { %v104_v7 = vadd.f32 %v197_v5, %v103_v6 }
  0xc5   :  { %v211_v8 = vpop.f32.mrf.mxu0 }
  0xc6   :  { %v107_v9 = vmax.f32 %v104_v7, 0.0 }
  0xc8   :  { %217 = vmatmul.mubr.msk.f32.vlgmr.msra.gmra.mxu1 %vm117_vm3, %v107_v9 }
 0x188   :  { %v187_v11 = vpop.f32.mrf.mxu1 }
 0x189   :  { %v188_v12 = vadd.f32 %v200_v10, %v187_v11 }
 0x18a   :  { %v218_v13 = vpop.f32.mrf.mxu1 }
 0x18b   :  { %192 = vst.msk [vmem:[%s279_s5] sm:$0xff] %vm191_vm4, %v188_v12 }

</bundles_post_ra>
